<compile_context>
chip_gen: v7x
topology: tpu7x:2x2x1
jax: 0.10.0
libtpu: 0.0.40
codegen_flags: <defaults>
</compile_context>

<pallas_src>
import jax
import jax.numpy as jnp
import numpy as np
from jax.experimental import pallas as pl
from jax.experimental.pallas import tpu as pltpu


def _make_kernel(has_value: bool, has_mask: bool):
    """Builds a kernel specialized on which optional inputs are present."""

    def kernel(*refs):
        idx = 0
        qp_ref = refs[idx]; idx += 1            # [Bt, H]   pre-projected query
        pk_ref = refs[idx]; idx += 1            # [Bt, M, H]
        v_ref = None
        if has_value:
            v_ref = refs[idx]; idx += 1         # [Bt, M, Hv]
        mask_ref = None
        if has_mask:
            mask_ref = refs[idx]; idx += 1      # [Bt, M]
        we_ref = refs[idx]; idx += 1            # [1, H]
        ctx_ref, alpha_ref = refs[idx], refs[idx + 1]   # [Bt, Hv], [Bt, M]

        qp = qp_ref[...].astype(jnp.float32)    # [Bt, H]
        pk = pk_ref[...].astype(jnp.float32)    # [Bt, M, H]
        we = we_ref[...].astype(jnp.float32)    # [1, H]

        # tanh(query + proj_key): broadcast over the seq dim (VPU add + EUP tanh)
        t = jnp.tanh(qp[:, None, :] + pk)       # [Bt, M, H]

        # energy_layer: contract H with We -> VPU multiply + XLU lane reduce
        scores = jnp.sum(t * we, axis=-1)       # [Bt, M]

        if has_mask:
            scores = jnp.where(mask_ref[...] == 0,
                               jnp.float32(-jnp.inf), scores)

        # softmax over the sequence axis (lane reduces)
        m = jnp.max(scores, axis=-1, keepdims=True)
        e = jnp.exp(scores - m)
        s = jnp.sum(e, axis=-1, keepdims=True)
        alphas = e / s                          # [Bt, M] (exact normalization)

        # context = bmm(alphas, value); reuse proj_key tile on the default path
        val = v_ref[...].astype(jnp.float32) if has_value else pk   # [Bt, M, Hv]
        ctx = jnp.sum(alphas[:, :, None] * val, axis=1)             # [Bt, Hv]

        alpha_ref[...] = alphas.astype(alpha_ref.dtype)
        ctx_ref[...] = ctx.astype(ctx_ref.dtype)

    return kernel


def _pick_block_b(B, M, H, Hv, has_value, itemsize=4, budget_bytes=8 << 20):
    """Largest batch tile whose double-buffered working set fits the budget."""
    per_row = M * H + (M * Hv if has_value else 0) + H + M + Hv + M
    per_row *= 2 * itemsize                     # double-buffered pipeline
    bt = max(1, budget_bytes // per_row)
    if bt >= B:
        return B                                # single grid step: block == full dim
    bt = max(8, (bt // 8) * 8)                  # multi-step: sublane-aligned tile
    return min(bt, B)


def bahdanau_attention(query, proj_key, wq, we, value=None, mask=None,
                       *, block_b=None):
    """query [B,1,Q], proj_key [B,M,H], wq [H,Q] (nn.Linear weight), we [1,H]."""
    B, _, Q = query.shape
    _, M, H = proj_key.shape
    has_value = value is not None
    has_mask = mask is not None
    Hv = value.shape[2] if has_value else H

    # Hoist query projection: one XLA matmul for the whole batch -> qp [B, H].
    qp = jnp.einsum('bq,hq->bh', query[:, 0, :], wq)

    bt = _pick_block_b(B, M, H, Hv, has_value) if block_b is None else block_b
    grid_b = pl.cdiv(B, bt)
    Bp = grid_b * bt
    pad = Bp - B

    def pad_b(x, fill=0):
        if pad == 0:
            return x
        return jnp.pad(x, ((0, pad),) + ((0, 0),) * (x.ndim - 1),
                       constant_values=fill)

    inputs = [pad_b(qp), pad_b(proj_key)]
    in_specs = [
        pl.BlockSpec((bt, H), lambda b: (b, 0)),         # qp
        pl.BlockSpec((bt, M, H), lambda b: (b, 0, 0)),   # proj_key
    ]
    if has_value:
        inputs.append(pad_b(value))
        in_specs.append(pl.BlockSpec((bt, M, Hv), lambda b: (b, 0, 0)))
    if has_mask:
        # pad rows as "valid" so padded batch rows don't produce all-masked NaNs
        inputs.append(pad_b(mask.astype(jnp.int32)[:, 0, :], fill=1))
        in_specs.append(pl.BlockSpec((bt, M), lambda b: (b, 0)))
    inputs.append(we)
    in_specs.append(pl.BlockSpec((1, H), lambda b: (0, 0)))  # We (grid-invariant)

    out_shape = (
        jax.ShapeDtypeStruct((Bp, Hv), query.dtype),
        jax.ShapeDtypeStruct((Bp, M), query.dtype),
    )
    out_specs = [
        pl.BlockSpec((bt, Hv), lambda b: (b, 0)),
        pl.BlockSpec((bt, M), lambda b: (b, 0)),
    ]

    context, alphas = pl.pallas_call(
        _make_kernel(has_value, has_mask),
        grid_spec=pltpu.PrefetchScalarGridSpec(
            num_scalar_prefetch=0,
            grid=(grid_b,),
            in_specs=in_specs,
            out_specs=out_specs,
        ),
        out_shape=out_shape,
        compiler_params=pltpu.CompilerParams(
            dimension_semantics=("parallel",)),
    )(*inputs)

    # restore the [B, 1, X] shapes of the PyTorch module (free reshapes)
    context = context[:B][:, None, :]
    alphas = alphas[:B][:, None, :]
    return context, alphas


def _reference(query, proj_key, wq, we, value=None, mask=None):
    if value is None:
        value = proj_key
    q = jnp.einsum('blq,hq->blh', query, wq)             # query_layer
    t = jnp.tanh(q + proj_key)                           # [B, M, H]
    scores = jnp.einsum('bmh,oh->bmo', t, we)            # [B, M, 1]
    scores = jnp.transpose(scores, (0, 2, 1))            # [B, 1, M]
    if mask is not None:
        scores = jnp.where(mask == 0, -jnp.inf, scores)
    alphas = jax.nn.softmax(scores, axis=-1)
    context = jnp.einsum('bom,bmh->boh', alphas, value)
    return context, alphas


if __name__ == "__main__":
    B, M, H = 2, 8, 32          # batch, seq, hidden_size
    Q = H                       # query_size defaults to hidden_size

    key = jax.random.PRNGKey(0)
    k1, k2, k3, k4, k5 = jax.random.split(key, 5)

    query = jax.random.normal(k1, (B, 1, Q), jnp.float32)
    proj_key = jax.random.normal(k2, (B, M, H), jnp.float32)
    # nn.Linear weights: query_layer.weight [H, Q], energy_layer.weight [1, H]
    wq = (jax.random.normal(k3, (H, Q), jnp.float32) / jnp.sqrt(Q)).astype(jnp.float32)
    we = (jax.random.normal(k4, (1, H), jnp.float32) / jnp.sqrt(H)).astype(jnp.float32)

    # mask: batch 0 fully valid; batch 1 has last 2 positions masked out
    mask = np.ones((B, 1, M), np.int32)
    mask[1, 0, -2:] = 0
    mask = jnp.asarray(mask)

    # --- Test 1: default path (value is None -> proj_key reused, no extra DMA)
    context, alphas = bahdanau_attention(query, proj_key, wq, we,
                                         value=None, mask=mask)
    jax.block_until_ready((context, alphas))
    ref_ctx, ref_alpha = _reference(query, proj_key, wq, we, value=None, mask=mask)
    np.testing.assert_allclose(np.asarray(context), np.asarray(ref_ctx),
                               rtol=1e-5, atol=1e-5)
    np.testing.assert_allclose(np.asarray(alphas), np.asarray(ref_alpha),
                               rtol=1e-5, atol=1e-5)

    # --- Test 2: explicit value, no mask
    value = jax.random.normal(k5, (B, M, H), jnp.float32)
    context2, alphas2 = bahdanau_attention(query, proj_key, wq, we,
                                           value=value, mask=None)
    jax.block_until_ready((context2, alphas2))
    ref_ctx2, ref_alpha2 = _reference(query, proj_key, wq, we, value=value, mask=None)
    np.testing.assert_allclose(np.asarray(context2), np.asarray(ref_ctx2),
                               rtol=1e-5, atol=1e-5)
    np.testing.assert_allclose(np.asarray(alphas2), np.asarray(ref_alpha2),
                               rtol=1e-5, atol=1e-5)

    print("KERNEL_OK")
</pallas_src>

<mosaic_0001>
module attributes {stable_mosaic.version = 11 : i64} {
  func.func @kernel(%arg0: i32, %arg1: memref<2x32xf32, #tpu.memory_space<vmem>>, %arg2: memref<2x8x32xf32, #tpu.memory_space<vmem>>, %arg3: memref<2x8xi32, #tpu.memory_space<vmem>>, %arg4: memref<1x32xf32, #tpu.memory_space<vmem>>, %arg5: memref<2x32xf32, #tpu.memory_space<vmem>>, %arg6: memref<2x8xf32, #tpu.memory_space<vmem>>) attributes {dimension_semantics = [#tpu.dimension_semantics<parallel>], iteration_bounds = array<i64: 1>, scalar_prefetch = 0 : i64, scratch_operands = 0 : i64, tpu.core_type = #tpu.core_type<tc>, window_params = [{transform_indices = @transform_0, window_bounds = array<i64: 2, 32>}, {transform_indices = @transform_1, window_bounds = array<i64: 2, 8, 32>}, {transform_indices = @transform_2, window_bounds = array<i64: 2, 8>}, {pipeline_mode = #tpu.pipeline_mode<synchronous>, transform_indices = @transform_3, window_bounds = array<i64: 1, 32>}, {transform_indices = @transform_4, window_bounds = array<i64: 2, 32>}, {transform_indices = @transform_5, window_bounds = array<i64: 2, 8>}]} {
    %c0 = arith.constant 0 : index
    %c0_0 = arith.constant 0 : index
    %0 = vector.load %arg1[%c0, %c0_0] : memref<2x32xf32, #tpu.memory_space<vmem>>, vector<2x32xf32>
    %c0_1 = arith.constant 0 : index
    %c0_2 = arith.constant 0 : index
    %c0_3 = arith.constant 0 : index
    %1 = vector.load %arg2[%c0_1, %c0_2, %c0_3] : memref<2x8x32xf32, #tpu.memory_space<vmem>>, vector<2x8x32xf32>
    %c0_4 = arith.constant 0 : index
    %c0_5 = arith.constant 0 : index
    %2 = vector.load %arg4[%c0_4, %c0_5] : memref<1x32xf32, #tpu.memory_space<vmem>>, vector<1x32xf32>
    %3 = vector.shape_cast %0 : vector<2x32xf32> to vector<2x1x32xf32>
    %4 = vector.broadcast %3 : vector<2x1x32xf32> to vector<2x8x32xf32>
    %5 = arith.addf %4, %1 : vector<2x8x32xf32>
    %6 = math.tanh %5 : vector<2x8x32xf32>
    %7 = vector.shape_cast %2 : vector<1x32xf32> to vector<1x1x32xf32>
    %8 = vector.broadcast %7 : vector<1x1x32xf32> to vector<2x8x32xf32>
    %9 = arith.mulf %6, %8 : vector<2x8x32xf32>
    %cst = arith.constant dense<0.000000e+00> : vector<2x8xf32>
    %10 = vector.multi_reduction <add>, %9, %cst [2] : vector<2x8x32xf32> to vector<2x8xf32>
    %c0_6 = arith.constant 0 : index
    %c0_7 = arith.constant 0 : index
    %11 = vector.load %arg3[%c0_6, %c0_7] : memref<2x8xi32, #tpu.memory_space<vmem>>, vector<2x8xi32>
    %c0_i32 = arith.constant 0 : i32
    %12 = vector.broadcast %c0_i32 : i32 to vector<2x8xi32>
    %13 = arith.cmpi eq, %11, %12 : vector<2x8xi32>
    %cst_8 = arith.constant 0xFF800000 : f32
    %14 = vector.broadcast %cst_8 : f32 to vector<2x8xf32>
    %15 = arith.select %13, %14, %10 : vector<2x8xi1>, vector<2x8xf32>
    %cst_9 = arith.constant dense<0xFF800000> : vector<2xf32>
    %16 = vector.multi_reduction <maximumf>, %15, %cst_9 [1] : vector<2x8xf32> to vector<2xf32>
    %17 = vector.shape_cast %16 : vector<2xf32> to vector<2x1xf32>
    %18 = vector.broadcast %17 : vector<2x1xf32> to vector<2x8xf32>
    %19 = arith.subf %15, %18 : vector<2x8xf32>
    %20 = math.exp %19 : vector<2x8xf32>
    %cst_10 = arith.constant dense<0.000000e+00> : vector<2xf32>
    %21 = vector.multi_reduction <add>, %20, %cst_10 [1] : vector<2x8xf32> to vector<2xf32>
    %22 = vector.shape_cast %21 : vector<2xf32> to vector<2x1xf32>
    %23 = vector.broadcast %22 : vector<2x1xf32> to vector<2x8xf32>
    %24 = arith.divf %20, %23 : vector<2x8xf32>
    %25 = vector.shape_cast %24 : vector<2x8xf32> to vector<2x8x1xf32>
    %26 = vector.broadcast %25 : vector<2x8x1xf32> to vector<2x8x32xf32>
    %27 = arith.mulf %26, %1 : vector<2x8x32xf32>
    %cst_11 = arith.constant dense<0.000000e+00> : vector<2x32xf32>
    %28 = vector.multi_reduction <add>, %27, %cst_11 [1] : vector<2x8x32xf32> to vector<2x32xf32>
    %c0_12 = arith.constant 0 : index
    %c0_13 = arith.constant 0 : index
    %29 = vector.load %arg6[%c0_12, %c0_13] : memref<2x8xf32, #tpu.memory_space<vmem>>, vector<2x8xf32>
    tpu.vector_store %arg6[%c0_12, %c0_13], %24 {strides = array<i32>} : memref<2x8xf32, #tpu.memory_space<vmem>>, vector<2x8xf32>,
    %c0_14 = arith.constant 0 : index
    %c0_15 = arith.constant 0 : index
    %30 = vector.load %arg5[%c0_14, %c0_15] : memref<2x32xf32, #tpu.memory_space<vmem>>, vector<2x32xf32>
    tpu.vector_store %arg5[%c0_14, %c0_15], %28 {strides = array<i32>} : memref<2x32xf32, #tpu.memory_space<vmem>>, vector<2x32xf32>,
    return
  }
  func.func @transform_0(%arg0: i32) -> (i32, i32) {
    %c0_i32 = arith.constant 0 : i32
    %c0_i32_0 = arith.constant 0 : i32
    return %arg0, %c0_i32 : i32, i32
  }
  func.func @transform_1(%arg0: i32) -> (i32, i32, i32) {
    %c0_i32 = arith.constant 0 : i32
    %c0_i32_0 = arith.constant 0 : i32
    %c0_i32_1 = arith.constant 0 : i32
    return %arg0, %c0_i32, %c0_i32_0 : i32, i32, i32
  }
  func.func @transform_2(%arg0: i32) -> (i32, i32) {
    %c0_i32 = arith.constant 0 : i32
    %c0_i32_0 = arith.constant 0 : i32
    return %arg0, %c0_i32 : i32, i32
  }
  func.func @transform_3(%arg0: i32) -> (i32, i32) {
    %c0_i32 = arith.constant 0 : i32
    %c0_i32_0 = arith.constant 0 : i32
    %c0_i32_1 = arith.constant 0 : i32
    return %c0_i32, %c0_i32_0 : i32, i32
  }
  func.func @transform_4(%arg0: i32) -> (i32, i32) {
    %c0_i32 = arith.constant 0 : i32
    %c0_i32_0 = arith.constant 0 : i32
    return %arg0, %c0_i32 : i32, i32
  }
  func.func @transform_5(%arg0: i32) -> (i32, i32) {
    %c0_i32 = arith.constant 0 : i32
    %c0_i32_0 = arith.constant 0 : i32
    return %arg0, %c0_i32 : i32, i32
  }
}

</mosaic_0001>

<bundles_post_ra>
// kernel: tpu_custom_call.1
= control target key start
LH: loop header
LB: loop body
LE: loop exit
PB: predicated region body
PF: predicated region fallthrough
CT: control target
= control target key end

     0   :  { %11 = vsyncpa [#allocation3], 0  ;;  %s428_s0 = inlined_call_operand.hbm [shape: f32[2,32], index: 0, kind: input, shape index: {}]   ;;  %s429_s1 = inlined_call_operand.hbm [shape: f32[2,8,32], index: 1, kind: input, shape index: {}]   ;;  %s430_s2 = inlined_call_operand.vmem [shape: s32[2,8], index: 2, kind: input, shape index: {}]   ;;  %s431_s3 = inlined_call_operand.vmem [shape: f32[1,32], index: 3, kind: input, shape index: {}]   ;;  %s432_s4 = inlined_call_operand.hbm [shape: f32[2,32], index: 4, kind: output, shape index: {0}]   ;;  %s433_s5 = inlined_call_operand.hbm [shape: f32[2,8], index: 5, kind: output, shape index: {1}]  }
   0x1   :  { %12 = vsyncpa [#allocation6], 0 }
   0x2   :  { %13 = vsyncpa [#allocation4], 0 }
   0x3   :  { %14 = vsyncpa [#allocation9], 0  ;;  %s313_s18 = smov [#allocation2]   ;;  %s314_s20 = smov [#allocation5]  }
   0x4   :  { %s21_s19 = sshll.u32 %s313_s18, 4  ;;  %s30_s21 = sshll.u32 %s314_s20, 4  ;;  %s22_s19 = int_to_ptr.vmem [resolvable:$true] %s21_s19  ;;  %s350_s21 = int_to_ptr.vmem [resolvable:$true] %s30_s21 }
   0x5   :  { %s217_s24 = scalar_lea.hbm %s428_s0, 32 }
   0x6   :  { %p218_p0 = scmp.ne.s32.totalorder %s428_s0, %s217_s24  ;;  %p221_p1 = scmp.lt.u32.totalorder %s217_s24, %s428_s0 }
   0x8   :  { %p223_p2 = pnand %p221_p1, %p218_p0 }
   0xa   :  { %226 = shalt.err (!%p223_p2)
}
   0xb   :  { %s227_s29 = scalar_lea.vmem %s22_s19, 32  ;;  %p232_p4 = scmp.lt.s32.totalorder %s22_s19, %s22_s19 }
   0xc   :  { %p228_p3 = scmp.ne.s32.totalorder %s22_s19, %s227_s29  ;;  %p233_p5 = scmp.lt.s32.totalorder %s227_s29, %s227_s29 }
   0xe   :  { %p234_p6 = por %p233_p5, %p232_p4 }
  0x10   :  { %p235_p7 = pnand %p234_p6, %p228_p3 }
  0x12   :  { %238 = shalt.err (!%p235_p7)
}
  0x13   :  { %24 = dma.hbm_to_vmem [thread:$0]  %s428_s0, 32, %s22_s19, [#allocation3]  }
  0x14   :  { %s239_s9 = scalar_lea.hbm %s429_s1, 256 }
  0x15   :  { %p240_p8 = scmp.ne.s32.totalorder %s429_s1, %s239_s9  ;;  %p243_p9 = scmp.lt.u32.totalorder %s239_s9, %s429_s1 }
  0x17   :  { %p245_p10 = pnand %p243_p9, %p240_p8 }
  0x19   :  { %248 = shalt.err (!%p245_p10)
}
  0x1a   :  { %s249_s14 = scalar_lea.vmem %s350_s21, 256  ;;  %p254_p12 = scmp.lt.s32.totalorder %s350_s21, %s350_s21 }
  0x1b   :  { %p250_p11 = scmp.ne.s32.totalorder %s350_s21, %s249_s14  ;;  %p255_p13 = scmp.lt.s32.totalorder %s249_s14, %s249_s14 }
  0x1d   :  { %p256_p0 = por %p255_p13, %p254_p12 }
  0x1f   :  { %p257_p1 = pnand %p256_p0, %p250_p11 }
  0x21   :  { %260 = shalt.err (!%p257_p1)
}
  0x22   :  { %s315_s0 = smov 128   ;;  %s316_s15 = smov 8  }
  0x23   :  { %36 = dma.hbm_to_vmem [thread:$0]  %s429_s1, 256, %s350_s21, [#allocation6], %s315_s0, %s315_s0, %s316_s15  }
  0x24   :  { %305 = dma.done.wait [#allocation3], 32  }
  0x25   :  { %306 = vsyncadd [#allocation3], 4294967264 }
  0x26   :  { %307 = dma.done.wait [#allocation6], 256  }
  0x27   :  { %308 = vsyncadd [#allocation6], 4294967040  ;;  %v63_v0 = vlaneseq  ;;  %v317_v1 = vmov 1966171168   ;;  %v381_v10 = vld [vmem:[#allocation5] sm:$0xff]  ;;  %v383_v13 = vld [vmem:[#allocation5 + $0x8] sm:$0xff] }
  0x28   :  { %v61_v2 = vunpack.c.l.s4 %v317_v1  ;;  %v200_v7 = vld.sshfl [vmem:[#allocation2] sm:$0x11 pattern:$0x75316420]  ;;  %vm96_vm0 = vcmask 261120   ;;  %vm117_vm1 = vcmask 1041409  }
  0x29   :  { %v64_v3 = vshrl.u32 %v63_v0, 7  ;;  %v59_v9 = vcombine.high %v200_v7, %v200_v7  ;;  %v201_v17 = vld [vmem:[%s431_s3] ss:$0 sm:$0xff]  ;;  %v108_v24 = vand.u32 127, %v63_v0  ;;  %vm121_vm3 = vcmask 58368  }
  0x2a   :  { %v62_v4 = vunpack.c.0.s8 %v61_v2  ;;  %v103_v27 = vld [vmem:[%s430_s2] sm:$0x3]  ;;  %s318_s2 = smov [#allocation8]  }
  0x2b   :  { %v76_v6 = vsub.s32 0, %v64_v3  ;;  %v111_v26 = vsub.s32 %v108_v24, %v64_v3  ;;  %vm104_vm2 = vcmp.eq.s32.totalorder %v103_v27, 0  ;;  %v142_v40 = vsub.s32 1, %v64_v3  ;;  %s186_s3 = sshll.u32 %s318_s2, 4  ;;  %s187_s3 = int_to_ptr.vmem [resolvable:$true] %s186_s3 }
  0x2c   :  { %v65_v5 = vsub.s32 %v62_v4, %v64_v3  ;;  %s261_s21 = scalar_lea.vmem %s187_s3, 32  ;;  %p266_p3 = scmp.lt.s32.totalorder %s187_s3, %s187_s3 }
  0x2d   :  { %p262_p2 = scmp.ne.s32.totalorder %s187_s3, %s261_s21  ;;  %p267_p4 = scmp.lt.s32.totalorder %s261_s21, %s261_s21 }
  0x2e   :  { %v66_v8 = vrot.slane %v200_v7, %v65_v5  ;;  %v73_v12 = vrot.slane %v59_v9, %v65_v5 }
  0x2f   :  { %p268_p5 = por %p267_p4, %p266_p3 }
  0x30   :  { %v77_v11 = vrot.slane %v66_v8, %v76_v6  ;;  %v81_v15 = vrot.slane %v73_v12, %v76_v6 }
  0x31   :  { %p269_p6 = pnand %p268_p5, %p262_p2 }
  0x32   :  { %v84_v14 = vadd.f32 %v77_v11, %v381_v10  ;;  %v85_v16 = vadd.f32 %v81_v15, %v383_v13 }
  0x34   :  { %209 = vtanh.f32 %v84_v14 }
  0x35   :  { %211 = vtanh.f32 %v85_v16 }
  0x3e   :  { %v210_v18 = vpop.eup %209 }
  0x3f   :  { %v94_v19 = vmul.f32 %v210_v18, %v201_v17  ;;  %v212_v20 = vpop.eup %211 }
  0x40   :  { %v95_v22 = vmul.f32 %v212_v20, %v201_v17 }
  0x41   :  { %v97_v21 = vsel %vm96_vm0, %v94_v19, 0.0 }
  0x42   :  { %98 = vadd.xlane.f32.xlu0 %v97_v21  ;;  %v100_v23 = vsel %vm96_vm0, %v95_v22, 0.0 }
  0x46   :  { %101 = vadd.xlane.f32.xlu0 %v100_v23 }
  0xcf   :  { %v99_v25 = vpop.xlane.xlu0 %98 }
  0xd0   :  { %v112_v29 = vrot.slane %v99_v25, %v111_v26 }
  0xd3   :  { %v102_v28 = vpop.xlane.xlu0 %101 }
  0xd4   :  { %v116_v30 = vrot.slane %v102_v28, %v111_v26 }
  0xd6   :  { %v118_v31 = vsel %vm117_vm1, %v116_v30, %v112_v29 }
  0xd7   :  { %v120_v32 = vsel %vm104_vm2, -inf, %v118_v31 }
  0xd8   :  { %v122_v33 = vsel %vm121_vm3, %v120_v32, -inf }
  0xd9   :  { %123 = vmax.xlane.f32.xlu1 %v122_v33 }
 0x166   :  { %v124_v34 = vpop.xlane.xlu1 %123 }
 0x167   :  { %v125_v35 = vsub.f32 %v120_v32, %v124_v34 }
 0x169   :  { %v126_v36 = vmul.f32 1.442695, %v125_v35 }
 0x16b   :  { %213 = vpow2.f32 %v126_v36 }
 0x175   :  { %v214_v37 = vpop.eup %213 }
 0x176   :  { %v128_v38 = vsel %vm121_vm3, %v214_v37, 0.0 }
 0x177   :  { %129 = vadd.xlane.f32.xlu1 %v128_v38 }
 0x204   :  { %v130_v39 = vpop.xlane.xlu1 %129 }
 0x205   :  { %215 = vrcp.f32 %v130_v39 }
 0x20f   :  { %v216_v41 = vpop.eup %215 }
 0x210   :  { %v132_v42 = vmul.f32 %v216_v41, %v214_v37 }
 0x212   :  { %v143_v43 = vrot.slane %v132_v42, %v142_v40  ;;  %163 = vst.msk [vmem:[#allocation8] sm:$0x3] %vm121_vm3, %v132_v42  ;;  %v136_v44 = vrot.slane %v132_v42, %v76_v6 }
 0x214   :  { %145 = vbcast.lane.b32.xlu1 %v143_v43, 256  ;;  %138 = vbcast.lane.b32.xlu0 %v136_v44, 256 }
 0x215   :  { %272 = shalt.err (!%p269_p6)
}
 0x216   :  { %s273_s24 = scalar_lea.hbm %s433_s5, 32 }
 0x217   :  { %p274_p7 = scmp.ne.s32.totalorder %s433_s5, %s273_s24  ;;  %p277_p8 = scmp.lt.u32.totalorder %s273_s24, %s433_s5 }
 0x219   :  { %p279_p9 = pnand %p277_p8, %p274_p7 }
 0x21b   :  { %282 = shalt.err (!%p279_p9)
}
 0x21c   :  { %189 = dma.vmem_to_hbm [thread:$0]  %s187_s3, 32, %s433_s5, [#allocation9]   ;;  %vm168_vm4 = vcmask 254976  }
 0x21d   :  { %s319_s5 = smov [#allocation7]  }
 0x21e   :  { %s176_s6 = sshll.u32 %s319_s5, 4  ;;  %s177_s6 = int_to_ptr.vmem [resolvable:$true] %s176_s6 }
 0x21f   :  { %s283_s7 = scalar_lea.vmem %s177_s6, 32  ;;  %p288_p11 = scmp.lt.s32.totalorder %s177_s6, %s177_s6 }
 0x220   :  { %p284_p10 = scmp.ne.s32.totalorder %s177_s6, %s283_s7  ;;  %p289_p12 = scmp.lt.s32.totalorder %s283_s7, %s283_s7 }
 0x222   :  { %p290_p13 = por %p289_p12, %p288_p11 }
 0x224   :  { %p291_p0 = pnand %p290_p13, %p284_p10 }
 0x286   :  { %v146_v45 = vpop.permute.xlu1 %145  ;;  %v139_v46 = vpop.permute.xlu0 %138 }
 0x287   :  { %v148_v47 = vmul.f32 %v146_v45, %v383_v13  ;;  %v147_v48 = vmul.f32 %v139_v46, %v381_v10 }
 0x289   :  { %v156_v49 = vsel %vm96_vm0, %v148_v47, 0.0  ;;  %v149_v50 = vsel %vm96_vm0, %v147_v48, 0.0 }
 0x28a   :  { %v157_v51 = vrot.slane %v156_v49, 4  ;;  %v150_v52 = vrot.slane %v149_v50, 4 }
 0x28c   :  { %v158_v53 = vadd.f32 %v157_v51, %v156_v49  ;;  %v151_v54 = vadd.f32 %v150_v52, %v149_v50 }
 0x28e   :  { %v159_v55 = vrot.slane %v158_v53, 2  ;;  %v152_v56 = vrot.slane %v151_v54, 2 }
 0x290   :  { %v160_v57 = vadd.f32 %v159_v55, %v158_v53  ;;  %v153_v58 = vadd.f32 %v152_v56, %v151_v54 }
 0x292   :  { %v161_v59 = vrot.slane %v160_v57, 1  ;;  %v154_v60 = vrot.slane %v153_v58, 1 }
 0x294   :  { %v162_v61 = vadd.f32 %v161_v59, %v160_v57  ;;  %v155_v62 = vadd.f32 %v154_v60, %v153_v58 }
 0x296   :  { %v166_v63 = vsel %vm117_vm1, %v162_v61, %v155_v62 }
 0x297   :  { %169 = vst.msk [vmem:[#allocation7] sm:$0x3] %vm168_vm4, %v166_v63 }
 0x298   :  { %294 = shalt.err (!%p291_p0)
}
 0x299   :  { %s295_s10 = scalar_lea.hbm %s432_s4, 32 }
 0x29a   :  { %p296_p1 = scmp.ne.s32.totalorder %s432_s4, %s295_s10  ;;  %p299_p2 = scmp.lt.u32.totalorder %s295_s10, %s432_s4 }
 0x29c   :  { %p301_p3 = pnand %p299_p2, %p296_p1 }
 0x29e   :  { %304 = shalt.err (!%p301_p3)
}
 0x29f   :  { %179 = dma.vmem_to_hbm [thread:$0]  %s177_s6, 32, %s432_s4, [#allocation4]  }
 0x2a0   :  { %309 = dma.done.wait [#allocation4], 32  }
 0x2a1   :  { %310 = vsyncadd [#allocation4], 4294967264 }
 0x2a2   :  { %311 = dma.done.wait [#allocation9], 32  }
 0x2a3   :  { %312 = vsyncadd [#allocation9], 4294967264 }
 0x2a4   :  { %196 = vsyncpa [#allocation3], 1 }
 0x2a5   :  { %197 = vsyncpa [#allocation6], 1 }
 0x2a6   :  { %198 = vsyncpa [#allocation4], 1 }
 0x2a7   :  { %199 = vsyncpa [#allocation9], 1 }

</bundles_post_ra>
